<compile_context>
chip_gen: v7x
topology: tpu7x:2x2x1
jax: 0.10.0
libtpu: 0.0.40
codegen_flags: <defaults>
</compile_context>

<pallas_src>
import functools

import jax
import jax.numpy as jnp
from jax.experimental import pallas as pl
from jax.experimental.pallas import tpu as pltpu


PACK_W = 128     # lane-dense packed-output width (one full lane row)
_MAX_TB = 256    # max batch-block rows before switching to a multi-block grid


# ----------------------------------------------------------------------------
# Pallas kernels
# ----------------------------------------------------------------------------
def fused_eval_kernel(x_ref, act_ref, w1_ref, b1_ref, w2_ref, b2_ref, out_ref,
                      *, num_actions):
    """NsfrActorCritic.evaluate() in a single fused kernel.

    x_ref   : (TB, DL+DN)  concat(logic, neural) activations
    w1_ref  : (DL+DN, 2H)  block-diagonal [[a_w1,0],[0,c_w1]]
    w2_ref  : (2H, 128)    lane-dense head: cols [0,A)=actor, col A=critic
    out_ref : (TB, 128)    packed slab:
        cols [0, A) : action probabilities
        col  A      : log p[action]
        col  A + 1  : dist entropy
        col  A + 2  : state value
        rest        : zeros
    """
    A = num_actions

    # ---- two fused MXU passes (actor + critic share each pass) ----
    x = x_ref[...]
    h = jnp.dot(x, w1_ref[...], preferred_element_type=jnp.float32) + b1_ref[...]
    h = jnp.maximum(h, 0.0)
    z = jnp.dot(h, w2_ref[...], preferred_element_type=jnp.float32) + b2_ref[...]

    # ---- masked, numerically-stable softmax over the logit columns ----
    cols = jax.lax.broadcasted_iota(jnp.int32, z.shape, 1)           # (TB, 128)
    is_logit = cols < A
    logits = jnp.where(is_logit, z, jnp.float32(-1e30))
    m = jnp.max(logits, axis=-1, keepdims=True)
    shifted = logits - m
    e = jnp.exp(shifted)                                             # EUP
    denom = jnp.sum(e, axis=-1, keepdims=True)                       # XLU
    log_softmax = shifted - jnp.log(denom)
    probs = e / denom            # exact divide: sum(probs) == 1 (PPO ratios)

    # Categorical entropy (guard padded cols: probs there are exactly 0)
    ent = -jnp.sum(jnp.where(is_logit, probs * log_softmax, 0.0),
                   axis=-1, keepdims=True)                           # (TB, 1)

    # Categorical.log_prob(action): one-hot select (no dynamic gather on TPU)
    a = act_ref[...]                                                 # (TB, 1)
    logp = jnp.sum(jnp.where(cols == a, log_softmax, 0.0),
                   axis=-1, keepdims=True)                           # (TB, 1)

    # critic value lives in column A of the shared head output
    v = jnp.sum(jnp.where(cols == A, z, 0.0), axis=-1, keepdims=True)

    # ---- assemble slab in registers, ONE unmasked full-width store ----
    slab = jnp.where(is_logit, probs,
           jnp.where(cols == A, jnp.broadcast_to(logp, z.shape),
           jnp.where(cols == A + 1, jnp.broadcast_to(ent, z.shape),
           jnp.where(cols == A + 2, jnp.broadcast_to(v, z.shape), 0.0))))
    out_ref[...] = slab


def greedy_act_kernel(xl_ref, aw1_ref, ab1_ref, aw2_ref, ab2_ref,
                      slab_ref, idx_ref):
    """NsfrActorCritic.act() greedy path (epsilon == 0), fully fused.

    slab_ref : (B, 128) f32 — log p[a*] broadcast across all lanes (read col 0)
    idx_ref  : (1, 1)  int32 — a* = first argmax of row 0's action probs
    """
    xl = xl_ref[...]
    h = jnp.dot(xl, aw1_ref[...], preferred_element_type=jnp.float32) + ab1_ref[...]
    h = jnp.maximum(h, 0.0)
    logits = jnp.dot(h, aw2_ref[...], preferred_element_type=jnp.float32) + ab2_ref[...]

    # log-softmax only (no probs / reciprocal needed on this path)
    m = jnp.max(logits, axis=-1, keepdims=True)
    shifted = logits - m
    denom = jnp.sum(jnp.exp(shifted), axis=-1, keepdims=True)
    log_softmax = shifted - jnp.log(denom)

    # First argmax of row 0 (argmax of probs == argmax of logits); tie-break =
    # lowest index, matching the PyTorch `.nonzero()[0]` behaviour.
    A = logits.shape[-1]
    row0 = logits[0:1, :]
    mx = jnp.max(row0, axis=-1, keepdims=True)
    cols0 = jax.lax.broadcasted_iota(jnp.int32, row0.shape, 1)
    sentinel = jnp.full(row0.shape, A, jnp.int32)
    idx = jnp.min(jnp.where(row0 == mx, cols0, sentinel),
                  axis=-1, keepdims=True)                            # (1, 1) i32

    # log_prob of that action under every batch row's distribution.
    cols = jax.lax.broadcasted_iota(jnp.int32, logits.shape, 1)
    logp = jnp.sum(jnp.where(cols == idx, log_softmax, 0.0),
                   axis=-1, keepdims=True)                           # (B, 1)

    slab_ref[...] = jnp.broadcast_to(logp, (logits.shape[0], slab_ref.shape[1]))
    idx_ref[...] = idx


# ----------------------------------------------------------------------------
# Specs / helpers
# ----------------------------------------------------------------------------
def _vspec(shape):
    """Gridless whole-array block, pinned in VMEM."""
    return pl.BlockSpec(shape, lambda: (0,) * len(shape),
                        memory_space=pltpu.MemorySpace.VMEM)


def _wspec(shape):
    """Weight block under a 1-D batch grid: always block (0,0) (VMEM-resident)."""
    return pl.BlockSpec(shape, lambda i: (0,) * len(shape),
                        memory_space=pltpu.MemorySpace.VMEM)


def _bspec(tb, width):
    """Batch-blocked activation/output spec under a 1-D batch grid."""
    return pl.BlockSpec((tb, width), lambda i: (i, 0),
                        memory_space=pltpu.MemorySpace.VMEM)


def _round_up(n, m):
    return ((n + m - 1) // m) * m


def _batch_tiling(batch):
    """(padded batch, batch block) — pad to sublane multiple; grid for big B."""
    if batch <= _MAX_TB:
        bp = _round_up(batch, 8)
        return bp, bp
    bp = _round_up(batch, _MAX_TB)
    return bp, _MAX_TB


# ----------------------------------------------------------------------------
# One-time parameter packing (per params, NOT per call)
# ----------------------------------------------------------------------------
def prepare_fused_params(params):
    aw1, ab1, aw2, ab2 = (params["a_w1"], params["a_b1"],
                          params["a_w2"], params["a_b2"])
    cw1, cb1, cw2, cb2 = (params["c_w1"], params["c_b1"],
                          params["c_w2"], params["c_b2"])
    dl, h = aw1.shape
    dn = cw1.shape[0]
    a = aw2.shape[1]
    assert a + 3 <= PACK_W, "packed slab requires num_actions + 3 <= 128"

    # layer 1: block-diagonal [[a_w1, 0], [0, c_w1]] — one shared MXU pass
    w1 = jnp.zeros((dl + dn, 2 * h), jnp.float32)
    w1 = w1.at[:dl, :h].set(aw1).at[dl:, h:].set(cw1)
    b1 = jnp.concatenate([ab1, cb1], axis=1)

    # heads: lane-dense (2H, 128) — cols [0,A) actor logits, col A critic value
    w2 = jnp.zeros((2 * h, PACK_W), jnp.float32)
    w2 = w2.at[:h, :a].set(aw2).at[h:, a:a + 1].set(cw2)
    b2 = jnp.zeros((1, PACK_W), jnp.float32)
    b2 = b2.at[:, :a].set(ab2).at[:, a:a + 1].set(cb2)

    return {"w1": w1, "b1": b1, "w2": w2, "b2": b2,
            # raw actor params for the act() path
            "a_w1": aw1, "a_b1": ab1, "a_w2": aw2, "a_b2": ab2}


# ----------------------------------------------------------------------------
# Wrappers
# ----------------------------------------------------------------------------
@jax.jit
def nsfr_evaluate(neural_state, logic_state, action, fused):
    """Mirrors NsfrActorCritic.evaluate (single fused pallas_call).

    Returns (action_logprobs, state_values, dist_entropy, action_probs);
    the 4th output is extra (handy for parity checks) and costs nothing.
    """
    B = logic_state.shape[0]
    xl = logic_state.reshape(B, -1).astype(jnp.float32)
    xn = neural_state.reshape(B, -1).astype(jnp.float32)
    x = jnp.concatenate([xl, xn], axis=1)
    a = action.astype(jnp.int32).reshape(B, 1)
    A = fused["a_w2"].shape[1]

    b_pad, tb = _batch_tiling(B)
    if b_pad != B:
        x = jnp.pad(x, ((0, b_pad - B), (0, 0)))
        a = jnp.pad(a, ((0, b_pad - B), (0, 0)))

    slab = pl.pallas_call(
        functools.partial(fused_eval_kernel, num_actions=A),
        out_shape=jax.ShapeDtypeStruct((b_pad, PACK_W), jnp.float32),
        grid_spec=pltpu.PrefetchScalarGridSpec(
            num_scalar_prefetch=0,
            grid=(b_pad // tb,),
            in_specs=[_bspec(tb, x.shape[1]),
                      _bspec(tb, 1),
                      _wspec(fused["w1"].shape),
                      _wspec(fused["b1"].shape),
                      _wspec(fused["w2"].shape),
                      _wspec(fused["b2"].shape)],
            out_specs=_bspec(tb, PACK_W)),
        compiler_params=pltpu.CompilerParams(
            dimension_semantics=("parallel",)),
    )(x, a, fused["w1"], fused["b1"], fused["w2"], fused["b2"])

    slab = slab[:B]
    action_probs = slab[:, :A]
    action_logprobs = slab[:, A]
    dist_entropy = slab[:, A + 1]
    state_values = slab[:, A + 2:A + 3]
    return action_logprobs, state_values, dist_entropy, action_probs


@jax.jit
def _greedy_act(logic_state, fused):
    B = logic_state.shape[0]
    xl = logic_state.reshape(B, -1).astype(jnp.float32)
    b_pad = _round_up(B, 8)
    if b_pad != B:
        xl = jnp.pad(xl, ((0, b_pad - B), (0, 0)))

    aw1, ab1, aw2, ab2 = (fused["a_w1"], fused["a_b1"],
                          fused["a_w2"], fused["a_b2"])

    slab, idx = pl.pallas_call(
        greedy_act_kernel,
        out_shape=(jax.ShapeDtypeStruct((b_pad, PACK_W), jnp.float32),
                   jax.ShapeDtypeStruct((1, 1), jnp.int32)),
        in_specs=[_vspec(xl.shape), _vspec(aw1.shape), _vspec(ab1.shape),
                  _vspec(aw2.shape), _vspec(ab2.shape)],
        out_specs=(_vspec((b_pad, PACK_W)), _vspec((1, 1))),
    )(xl, aw1, ab1, aw2, ab2)

    action = idx[0, 0]
    action_logprob = slab[:B, 0]
    return action, action_logprob


def nsfr_act(logic_state, fused, epsilon=0.0, rng=None):
    """Mirrors NsfrActorCritic.act.

    Greedy (epsilon == 0) path is a single fused kernel.  The epsilon
    exploration branch samples from a *host-side* random.Random and a uniform
    Categorical, so it is handled in host glue (no device work needed).
    """
    if rng is not None and epsilon > 0.0 and rng.random() < epsilon:
        A = fused["a_w2"].shape[1]
        action = jnp.int32(rng.randrange(A))
        action_logprob = -jnp.log(jnp.float32(A))
        return action, action_logprob
    return _greedy_act(logic_state, fused)


# ----------------------------------------------------------------------------
# Deterministic parameter construction (synthetic, not a checkpoint)
# ----------------------------------------------------------------------------
def make_params(key, d_logic, d_neural, hidden, num_actions):
    ks = jax.random.split(key, 8)
    s = 0.1
    return {
        "a_w1": s * jax.random.normal(ks[0], (d_logic, hidden), jnp.float32),
        "a_b1": s * jax.random.normal(ks[1], (1, hidden), jnp.float32),
        "a_w2": s * jax.random.normal(ks[2], (hidden, num_actions), jnp.float32),
        "a_b2": s * jax.random.normal(ks[3], (1, num_actions), jnp.float32),
        "c_w1": s * jax.random.normal(ks[4], (d_neural, hidden), jnp.float32),
        "c_b1": s * jax.random.normal(ks[5], (1, hidden), jnp.float32),
        "c_w2": s * jax.random.normal(ks[6], (hidden, 1), jnp.float32),
        "c_b2": s * jax.random.normal(ks[7], (1, 1), jnp.float32),
    }


# ----------------------------------------------------------------------------
# Pure-JAX reference (correctness oracle)
# ----------------------------------------------------------------------------
def _reference_evaluate(neural_state, logic_state, action, params):
    hp = jax.lax.Precision.HIGHEST
    B = logic_state.shape[0]
    xl = logic_state.reshape(B, -1).astype(jnp.float32)
    xn = neural_state.reshape(B, -1).astype(jnp.float32)
    h = jnp.maximum(jnp.dot(xl, params["a_w1"], precision=hp) + params["a_b1"], 0.0)
    logits = jnp.dot(h, params["a_w2"], precision=hp) + params["a_b2"]
    probs = jax.nn.softmax(logits, axis=-1)
    logsm = jax.nn.log_softmax(logits, axis=-1)
    logprobs = jnp.take_along_axis(logsm, action[:, None].astype(jnp.int32), axis=-1)[:, 0]
    entropy = -jnp.sum(probs * logsm, axis=-1)
    hc = jnp.maximum(jnp.dot(xn, params["c_w1"], precision=hp) + params["c_b1"], 0.0)
    values = jnp.dot(hc, params["c_w2"], precision=hp) + params["c_b2"]
    return logprobs, values, entropy, probs, logsm


if __name__ == "__main__":
    key = jax.random.PRNGKey(0)
    k_p, k_l, k_n, k_a, k_l2, k_n2, k_a2 = jax.random.split(key, 7)

    B = 8                 # batch (multiple of 8 -> full sublane utilization)
    N_OBJ, N_FEAT = 4, 8  # logic state: objects x valuation features
    D_NEURAL = 32         # neural state dim
    HIDDEN = 32
    NUM_ACTIONS = 5       # len(prednames)

    params = make_params(k_p, N_OBJ * N_FEAT, D_NEURAL, HIDDEN, NUM_ACTIONS)
    fused = prepare_fused_params(params)   # once per params, not per call

    logic_state = jax.random.normal(k_l, (B, N_OBJ, N_FEAT), jnp.float32)
    neural_state = jax.random.normal(k_n, (B, D_NEURAL), jnp.float32)
    action = jax.random.randint(k_a, (B,), 0, NUM_ACTIONS, jnp.int32)

    # evaluate() path — one fused pallas_call, one jit dispatch
    logprobs, values, entropy, probs = nsfr_evaluate(
        neural_state, logic_state, action, fused)
    jax.block_until_ready((logprobs, values, entropy, probs))

    # act() path (epsilon = 0, greedy) — one fused pallas_call (B=2 env states,
    # padded to 8 sublanes inside the wrapper)
    act_action, act_logprob = nsfr_act(logic_state[:2], fused, epsilon=0.0)
    jax.block_until_ready((act_action, act_logprob))

    # ---- correctness vs. pure-JAX reference ----
    ref_lp, ref_v, ref_ent, ref_p, ref_logsm = _reference_evaluate(
        neural_state, logic_state, action, params)

    assert probs.shape == (B, NUM_ACTIONS)
    assert logprobs.shape == (B,)
    assert values.shape == (B, 1)
    assert entropy.shape == (B,)
    assert bool(jnp.allclose(jnp.sum(probs, axis=-1), 1.0, atol=1e-3))
    assert bool(jnp.allclose(probs, ref_p, atol=1e-2))
    assert bool(jnp.allclose(logprobs, ref_lp, atol=1e-3))
    assert bool(jnp.allclose(values, ref_v, atol=1e-3))
    assert bool(jnp.allclose(entropy, ref_ent, atol=1e-2))

    ref_action = int(jnp.argmax(ref_p[0]))
    assert int(act_action) == ref_action
    assert act_logprob.shape == (2,)
    assert bool(jnp.allclose(act_logprob, ref_logsm[:2, ref_action], atol=1e-3))

    # ---- multi-block batch-grid path (weights VMEM-resident, parallel axis) ----
    BG = 2 * _MAX_TB
    logic_big = jax.random.normal(k_l2, (BG, N_OBJ, N_FEAT), jnp.float32)
    neural_big = jax.random.normal(k_n2, (BG, D_NEURAL), jnp.float32)
    action_big = jax.random.randint(k_a2, (BG,), 0, NUM_ACTIONS, jnp.int32)

    lp_g, v_g, ent_g, p_g = nsfr_evaluate(neural_big, logic_big, action_big, fused)
    jax.block_until_ready((lp_g, v_g, ent_g, p_g))

    rlp, rv, rent, rp, _ = _reference_evaluate(neural_big, logic_big, action_big, params)
    assert bool(jnp.allclose(p_g, rp, atol=1e-2))
    assert bool(jnp.allclose(lp_g, rlp, atol=1e-3))
    assert bool(jnp.allclose(v_g, rv, atol=1e-3))
    assert bool(jnp.allclose(ent_g, rent, atol=1e-2))

    print("KERNEL_OK")
</pallas_src>

<mosaic_0001>
module attributes {stable_mosaic.version = 11 : i64} {
  func.func @fused_eval_kernel(%arg0: i32, %arg1: memref<8x64xf32, #tpu.memory_space<vmem>>, %arg2: memref<8x1xi32, #tpu.memory_space<vmem>>, %arg3: memref<64x64xf32, #tpu.memory_space<vmem>>, %arg4: memref<1x64xf32, #tpu.memory_space<vmem>>, %arg5: memref<64x128xf32, #tpu.memory_space<vmem>>, %arg6: memref<1x128xf32, #tpu.memory_space<vmem>>, %arg7: memref<8x128xf32, #tpu.memory_space<vmem>>) attributes {dimension_semantics = [#tpu.dimension_semantics<parallel>], iteration_bounds = array<i64: 1>, scalar_prefetch = 0 : i64, scratch_operands = 0 : i64, tpu.core_type = #tpu.core_type<tc>, window_params = [{transform_indices = @transform_0, window_bounds = array<i64: 8, 64>}, {transform_indices = @transform_1, window_bounds = array<i64: 8, 1>}, {pipeline_mode = #tpu.pipeline_mode<synchronous>, transform_indices = @transform_2, window_bounds = array<i64: 64, 64>}, {pipeline_mode = #tpu.pipeline_mode<synchronous>, transform_indices = @transform_3, window_bounds = array<i64: 1, 64>}, {pipeline_mode = #tpu.pipeline_mode<synchronous>, transform_indices = @transform_4, window_bounds = array<i64: 64, 128>}, {pipeline_mode = #tpu.pipeline_mode<synchronous>, transform_indices = @transform_5, window_bounds = array<i64: 1, 128>}, {transform_indices = @transform_6, window_bounds = array<i64: 8, 128>}]} {
    %c0 = arith.constant 0 : index
    %c0_0 = arith.constant 0 : index
    %0 = vector.load %arg1[%c0, %c0_0] : memref<8x64xf32, #tpu.memory_space<vmem>>, vector<8x64xf32>
    %c0_1 = arith.constant 0 : index
    %c0_2 = arith.constant 0 : index
    %1 = vector.load %arg3[%c0_1, %c0_2] : memref<64x64xf32, #tpu.memory_space<vmem>>, vector<64x64xf32>
    %cst = arith.constant dense<0.000000e+00> : vector<8x64xf32>
    %2 = tpu.matmul %0, %1, %cst {dimension_numbers = #tpu.dot_dimension_numbers<[1], [0], [0], [1], [0, 0, 1, 1], [], []>} : vector<8x64xf32>, vector<64x64xf32>, vector<8x64xf32> -> vector<8x64xf32>
    %c0_3 = arith.constant 0 : index
    %c0_4 = arith.constant 0 : index
    %3 = vector.load %arg4[%c0_3, %c0_4] : memref<1x64xf32, #tpu.memory_space<vmem>>, vector<1x64xf32>
    %4 = vector.broadcast %3 : vector<1x64xf32> to vector<8x64xf32>
    %5 = arith.addf %2, %4 : vector<8x64xf32>
    %cst_5 = arith.constant 0.000000e+00 : f32
    %6 = vector.broadcast %cst_5 : f32 to vector<8x64xf32>
    %7 = arith.maximumf %5, %6 : vector<8x64xf32>
    %c0_6 = arith.constant 0 : index
    %c0_7 = arith.constant 0 : index
    %8 = vector.load %arg5[%c0_6, %c0_7] : memref<64x128xf32, #tpu.memory_space<vmem>>, vector<64x128xf32>
    %cst_8 = arith.constant dense<0.000000e+00> : vector<8x128xf32>
    %9 = tpu.matmul %7, %8, %cst_8 {dimension_numbers = #tpu.dot_dimension_numbers<[1], [0], [0], [1], [0, 0, 1, 1], [], []>} : vector<8x64xf32>, vector<64x128xf32>, vector<8x128xf32> -> vector<8x128xf32>
    %c0_9 = arith.constant 0 : index
    %c0_10 = arith.constant 0 : index
    %10 = vector.load %arg6[%c0_9, %c0_10] : memref<1x128xf32, #tpu.memory_space<vmem>>, vector<1x128xf32>
    %11 = vector.broadcast %10 : vector<1x128xf32> to vector<8x128xf32>
    %12 = arith.addf %9, %11 : vector<8x128xf32>
    %13 = tpu.iota {dimensions = array<i32: 1>} : vector<8x128xi32>
    %c5_i32 = arith.constant 5 : i32
    %14 = vector.broadcast %c5_i32 : i32 to vector<8x128xi32>
    %15 = arith.cmpi slt, %13, %14 : vector<8x128xi32>
    %cst_11 = arith.constant -1.000000e+30 : f32
    %16 = vector.broadcast %cst_11 : f32 to vector<8x128xf32>
    %17 = arith.select %15, %12, %16 : vector<8x128xi1>, vector<8x128xf32>
    %cst_12 = arith.constant dense<0xFF800000> : vector<8xf32>
    %18 = vector.multi_reduction <maximumf>, %17, %cst_12 [1] : vector<8x128xf32> to vector<8xf32>
    %19 = vector.shape_cast %18 : vector<8xf32> to vector<8x1xf32>
    %20 = vector.broadcast %19 : vector<8x1xf32> to vector<8x128xf32>
    %21 = arith.subf %17, %20 : vector<8x128xf32>
    %22 = math.exp %21 : vector<8x128xf32>
    %cst_13 = arith.constant dense<0.000000e+00> : vector<8xf32>
    %23 = vector.multi_reduction <add>, %22, %cst_13 [1] : vector<8x128xf32> to vector<8xf32>
    %24 = vector.shape_cast %23 : vector<8xf32> to vector<8x1xf32>
    %25 = math.log %24 : vector<8x1xf32>
    %26 = vector.broadcast %25 : vector<8x1xf32> to vector<8x128xf32>
    %27 = arith.subf %21, %26 : vector<8x128xf32>
    %28 = vector.broadcast %24 : vector<8x1xf32> to vector<8x128xf32>
    %29 = arith.divf %22, %28 : vector<8x128xf32>
    %30 = arith.mulf %29, %27 : vector<8x128xf32>
    %cst_14 = arith.constant 0.000000e+00 : f32
    %31 = vector.broadcast %cst_14 : f32 to vector<8x128xf32>
    %32 = arith.select %15, %30, %31 : vector<8x128xi1>, vector<8x128xf32>
    %cst_15 = arith.constant dense<0.000000e+00> : vector<8xf32>
    %33 = vector.multi_reduction <add>, %32, %cst_15 [1] : vector<8x128xf32> to vector<8xf32>
    %34 = vector.shape_cast %33 : vector<8xf32> to vector<8x1xf32>
    %cst_16 = arith.constant 0.000000e+00 : f32
    %35 = vector.broadcast %cst_16 : f32 to vector<8x1xf32>
    %36 = arith.subf %35, %34 : vector<8x1xf32>
    %c0_17 = arith.constant 0 : index
    %c0_18 = arith.constant 0 : index
    %37 = vector.load %arg2[%c0_17, %c0_18] : memref<8x1xi32, #tpu.memory_space<vmem>>, vector<8x1xi32>
    %38 = vector.broadcast %37 : vector<8x1xi32> to vector<8x128xi32>
    %39 = arith.cmpi eq, %13, %38 : vector<8x128xi32>
    %cst_19 = arith.constant 0.000000e+00 : f32
    %40 = vector.broadcast %cst_19 : f32 to vector<8x128xf32>
    %41 = arith.select %39, %27, %40 : vector<8x128xi1>, vector<8x128xf32>
    %cst_20 = arith.constant dense<0.000000e+00> : vector<8xf32>
    %42 = vector.multi_reduction <add>, %41, %cst_20 [1] : vector<8x128xf32> to vector<8xf32>
    %43 = vector.shape_cast %42 : vector<8xf32> to vector<8x1xf32>
    %c5_i32_21 = arith.constant 5 : i32
    %44 = vector.broadcast %c5_i32_21 : i32 to vector<8x128xi32>
    %45 = arith.cmpi eq, %13, %44 : vector<8x128xi32>
    %cst_22 = arith.constant 0.000000e+00 : f32
    %46 = vector.broadcast %cst_22 : f32 to vector<8x128xf32>
    %47 = arith.select %45, %12, %46 : vector<8x128xi1>, vector<8x128xf32>
    %cst_23 = arith.constant dense<0.000000e+00> : vector<8xf32>
    %48 = vector.multi_reduction <add>, %47, %cst_23 [1] : vector<8x128xf32> to vector<8xf32>
    %49 = vector.shape_cast %48 : vector<8xf32> to vector<8x1xf32>
    %c5_i32_24 = arith.constant 5 : i32
    %50 = vector.broadcast %c5_i32_24 : i32 to vector<8x128xi32>
    %51 = arith.cmpi eq, %13, %50 : vector<8x128xi32>
    %52 = vector.shape_cast %43 : vector<8x1xf32> to vector<8x1xf32>
    %53 = vector.broadcast %52 : vector<8x1xf32> to vector<8x128xf32>
    %c6_i32 = arith.constant 6 : i32
    %54 = vector.broadcast %c6_i32 : i32 to vector<8x128xi32>
    %55 = arith.cmpi eq, %13, %54 : vector<8x128xi32>
    %56 = vector.shape_cast %36 : vector<8x1xf32> to vector<8x1xf32>
    %57 = vector.broadcast %56 : vector<8x1xf32> to vector<8x128xf32>
    %c7_i32 = arith.constant 7 : i32
    %58 = vector.broadcast %c7_i32 : i32 to vector<8x128xi32>
    %59 = arith.cmpi eq, %13, %58 : vector<8x128xi32>
    %60 = vector.shape_cast %49 : vector<8x1xf32> to vector<8x1xf32>
    %61 = vector.broadcast %60 : vector<8x1xf32> to vector<8x128xf32>
    %cst_25 = arith.constant 0.000000e+00 : f32
    %62 = vector.broadcast %cst_25 : f32 to vector<8x128xf32>
    %63 = arith.select %59, %61, %62 : vector<8x128xi1>, vector<8x128xf32>
    %64 = arith.select %55, %57, %63 : vector<8x128xi1>, vector<8x128xf32>
    %65 = arith.select %51, %53, %64 : vector<8x128xi1>, vector<8x128xf32>
    %66 = arith.select %15, %29, %65 : vector<8x128xi1>, vector<8x128xf32>
    %c0_26 = arith.constant 0 : index
    %c0_27 = arith.constant 0 : index
    %67 = vector.load %arg7[%c0_26, %c0_27] : memref<8x128xf32, #tpu.memory_space<vmem>>, vector<8x128xf32>
    tpu.vector_store %arg7[%c0_26, %c0_27], %66 {strides = array<i32>} : memref<8x128xf32, #tpu.memory_space<vmem>>, vector<8x128xf32>,
    return
  }
  func.func @transform_0(%arg0: i32) -> (i32, i32) {
    %c0_i32 = arith.constant 0 : i32
    %c0_i32_0 = arith.constant 0 : i32
    return %arg0, %c0_i32 : i32, i32
  }
  func.func @transform_1(%arg0: i32) -> (i32, i32) {
    %c0_i32 = arith.constant 0 : i32
    %c0_i32_0 = arith.constant 0 : i32
    return %arg0, %c0_i32 : i32, i32
  }
  func.func @transform_2(%arg0: i32) -> (i32, i32) {
    %c0_i32 = arith.constant 0 : i32
    %c0_i32_0 = arith.constant 0 : i32
    %c0_i32_1 = arith.constant 0 : i32
    return %c0_i32, %c0_i32_0 : i32, i32
  }
  func.func @transform_3(%arg0: i32) -> (i32, i32) {
    %c0_i32 = arith.constant 0 : i32
    %c0_i32_0 = arith.constant 0 : i32
    %c0_i32_1 = arith.constant 0 : i32
    return %c0_i32, %c0_i32_0 : i32, i32
  }
  func.func @transform_4(%arg0: i32) -> (i32, i32) {
    %c0_i32 = arith.constant 0 : i32
    %c0_i32_0 = arith.constant 0 : i32
    %c0_i32_1 = arith.constant 0 : i32
    return %c0_i32, %c0_i32_0 : i32, i32
  }
  func.func @transform_5(%arg0: i32) -> (i32, i32) {
    %c0_i32 = arith.constant 0 : i32
    %c0_i32_0 = arith.constant 0 : i32
    %c0_i32_1 = arith.constant 0 : i32
    return %c0_i32, %c0_i32_0 : i32, i32
  }
  func.func @transform_6(%arg0: i32) -> (i32, i32) {
    %c0_i32 = arith.constant 0 : i32
    %c0_i32_0 = arith.constant 0 : i32
    return %arg0, %c0_i32 : i32, i32
  }
}

</mosaic_0001>

<bundles_post_ra>
// kernel: nsfr_evaluate.1
= control target key start
LH: loop header
LB: loop body
LE: loop exit
PB: predicated region body
PF: predicated region fallthrough
CT: control target
= control target key end

     0   :  { %11 = vsyncpa [#allocation3], 0  ;;  %s384_s21 = smov [#allocation2]   ;;  %s482_s0 = inlined_call_operand.vmem [shape: f32[8,64], index: 0, kind: input, shape index: {}]   ;;  %s483_s1 = inlined_call_operand.vmem [shape: s32[8,1], index: 1, kind: input, shape index: {}]   ;;  %s484_s2 = inlined_call_operand.vmem [shape: f32[64,64], index: 2, kind: input, shape index: {}]   ;;  %s485_s3 = inlined_call_operand.vmem [shape: f32[1,64], index: 3, kind: input, shape index: {}]   ;;  %s486_s4 = inlined_call_operand.hbm [shape: f32[64,128], index: 4, kind: input, shape index: {}]   ;;  %s487_s5 = inlined_call_operand.vmem [shape: f32[1,128], index: 5, kind: input, shape index: {}]   ;;  %s488_s6 = inlined_call_operand.vmem [shape: f32[8,128], index: 6, kind: output, shape index: {}]  }
   0x1   :  { %s25_s22 = sshll.u32 %s384_s21, 4  ;;  %s360_s25 = scalar_lea.hbm %s486_s4, 1024  ;;  %s26_s22 = int_to_ptr.vmem [resolvable:$true] %s25_s22 }
   0x2   :  { %p361_p0 = scmp.ne.s32.totalorder %s486_s4, %s360_s25  ;;  %p364_p1 = scmp.lt.u32.totalorder %s360_s25, %s486_s4 }
   0x4   :  { %p366_p2 = pnand %p364_p1, %p361_p0 }
   0x6   :  { %369 = shalt.err (!%p366_p2)
}
   0x7   :  { %s370_s30 = scalar_lea.vmem %s26_s22, 1024  ;;  %p375_p4 = scmp.lt.s32.totalorder %s26_s22, %s26_s22 }
   0x8   :  { %p371_p3 = scmp.ne.s32.totalorder %s26_s22, %s370_s30  ;;  %p376_p5 = scmp.lt.s32.totalorder %s370_s30, %s370_s30 }
   0xa   :  { %p377_p6 = por %p376_p5, %p375_p4 }
   0xc   :  { %p378_p7 = pnand %p377_p6, %p371_p3 }
   0xe   :  { %381 = shalt.err (!%p378_p7)
}
   0xf   :  { %s385_s7 = smov 128   ;;  %s386_s8 = smov 8  }
  0x10   :  { %31 = dma.hbm_to_vmem [thread:$0]  %s486_s4, 1024, %s26_s22, [#allocation3], %s385_s7, %s385_s7, %s386_s8  }
  0x11   :  { %382 = dma.done.wait [#allocation3], 1024  }
  0x12   :  { %383 = vsyncadd [#allocation3], 4294966272  ;;  %v387_v0 = vmov 0.0|0.0   ;;  %vm388_vm0 = vmmov 0   ;;  %v389_v1 = vmov 0.0   ;;  %v38_v2 = vld [vmem:[%s484_s2] sm:$0xff]  ;;  %v216_v32 = vlaneseq }
  0x13   :  { %321 = vmatprep.subr.bf16.mxu0 %v387_v0  ;;  %299 = vmatprep.mubr.msk.f32.mxu0 %vm388_vm0, %v389_v1  ;;  %v39_v3 = vld [vmem:[%s484_s2 + $0x8] sm:$0xff]  ;;  %v40_v4 = vld [vmem:[%s484_s2 + $0x10] sm:$0xff]  ;;  %v41_v6 = vld [vmem:[%s484_s2 + $0x18] sm:$0xff]  ;;  %vm53_vm1 = vcmask 523264   ;;  %v390_v40 = vmov 0  }
  0x14   :  { %333 = vmatprep.subr.bf16.mxu1 %v387_v0  ;;  %318 = vmatprep.mubr.msk.f32.mxu1 %vm388_vm0, %v389_v1  ;;  %v322_v5 = vpack.c.bf16 %v39_v3, %v38_v2  ;;  %v325_v7 = vpack.c.bf16 %v41_v6, %v40_v4  ;;  %v128_v8 = vld [vmem:[#allocation2] sm:$0xff]  ;;  %v129_v9 = vld [vmem:[#allocation2 + $0x8] sm:$0xff]  ;;  %v130_v10 = vld [vmem:[#allocation2 + $0x10] sm:$0xff]  ;;  %v217_v33 = vand.u32 127, %v216_v32 }
  0x15   :  { %v42_v11 = vld [vmem:[%s484_s2 + $0x20] sm:$0xff]  ;;  %v43_v12 = vld [vmem:[%s484_s2 + $0x28] sm:$0xff]  ;;  %v334_v13 = vpack.c.bf16 %v129_v9, %v128_v8  ;;  %v131_v14 = vld [vmem:[#allocation2 + $0x18] sm:$0xff]  ;;  %352 = vset.pattern.permute.xlu1 %v390_v40  ;;  %353 = vset.pattern.permute.xlu0 %v390_v40 }
  0x16   :  { %323 = vmatpush3.bf16.msra.mxu0 %v322_v5  ;;  %v337_v15 = vpack.c.bf16 %v131_v14, %v130_v10  ;;  %v328_v16 = vpack.c.bf16 %v43_v12, %v42_v11  ;;  %v132_v17 = vld [vmem:[#allocation2 + $0x20] sm:$0xff]  ;;  %v133_v18 = vld [vmem:[#allocation2 + $0x28] sm:$0xff]  ;;  %v44_v19 = vld [vmem:[%s484_s2 + $0x30] sm:$0xff]  ;;  %vm218_vm2 = vcmp.lt.s32.totalorder %v217_v33, 5  ;;  %vm245_vm3 = vcmp.eq.s32.totalorder %v217_v33, 5 }
  0x17   :  { %324 = vmatprep.subr.bf16.mxu0 %v387_v0  ;;  %335 = vmatpush3.bf16.msra.mxu1 %v334_v13  ;;  %v45_v20 = vld [vmem:[%s484_s2 + $0x38] sm:$0xff]  ;;  %v340_v21 = vpack.c.bf16 %v133_v18, %v132_v17  ;;  %v37_v23 = vld [vmem:[%s482_s0] sm:$0xff]  ;;  %v134_v24 = vld [vmem:[#allocation2 + $0x30] sm:$0xff]  ;;  %vm250_vm5 = vcmp.eq.s32.totalorder %v217_v33, 7  ;;  %vm249_vm6 = vcmp.eq.s32.totalorder %v217_v33, 6 }
  0x18   :  { %336 = vmatprep.subr.bf16.mxu1 %v387_v0  ;;  %v331_v22 = vpack.c.bf16 %v45_v20, %v44_v19  ;;  %v135_v25 = vld [vmem:[#allocation2 + $0x38] sm:$0xff]  ;;  %v261_v27 = vld [vmem:[%s485_s3] ss:$0 sm:$0xff] }
  0x19   :  { %v343_v26 = vpack.c.bf16 %v135_v25, %v134_v24  ;;  %v263_v34 = vld [vmem:[%s487_s5] ss:$0 sm:$0xff] }
  0x1a   :  { %326 = vmatpush3.bf16.msra.mxu0 %v325_v7  ;;  %v237_v39 = vld [vmem:[%s483_s1] sm:$0xff] }
  0x1b   :  { %327 = vmatprep.subr.bf16.mxu0 %v387_v0  ;;  %338 = vmatpush3.bf16.msra.mxu1 %v337_v15 }
  0x1c   :  { %339 = vmatprep.subr.bf16.mxu1 %v387_v0  ;;  %239 = vperm.xlu1 %352, %v237_v39  }
  0x1e   :  { %329 = vmatpush3.bf16.msra.mxu0 %v328_v16 }
  0x1f   :  { %330 = vmatprep.subr.bf16.mxu0 %v387_v0  ;;  %341 = vmatpush3.bf16.msra.mxu1 %v340_v21 }
  0x20   :  { %342 = vmatprep.subr.bf16.mxu1 %v387_v0 }
  0x22   :  { %332 = vmatpush3.bf16.msra.mxu0 %v331_v22 }
  0x23   :  { %344 = vmatpush3.bf16.msra.mxu1 %v343_v26 }
  0x25   :  { %300 = vmatmul.mubr.msk.f32.vlgmr.msra.gmra.mrb[0].mxu0 %vm53_vm1, %v37_v23 }
  0x9b   :  { %v240_v47 = vpop.permute.xlu1 %239 }
  0x9c   :  { %vm241_vm4 = vcmp.eq.s32.totalorder %v217_v33, %v240_v47 }
  0xf8   :  { %v123_v28 = vpop.f32.mrb[0].mxu0 }
  0xf9   :  { %v124_v29 = vadd.f32 %v261_v27, %v123_v28  ;;  %v301_v30 = vpop.f32.mrb[1].mxu0 }
  0xfb   :  { %v127_v31 = vmax.f32 %v124_v29, 0.0 }
  0xfd   :  { %319 = vmatmul.mubr.msk.f32.vlgmr.msra.gmra.mrb[0].mxu1 %vm53_vm1, %v127_v31 }
 0x1d0   :  { %v212_v35 = vpop.f32.mrb[0].mxu1 }
 0x1d1   :  { %v213_v36 = vadd.f32 %v263_v34, %v212_v35  ;;  %v320_v37 = vpop.f32.mrb[1].mxu1 }
 0x1d3   :  { %v219_v38 = vsel %vm218_vm2, %v213_v36, -1e+30  ;;  %v246_v45 = vsel %vm245_vm3, %v213_v36, 0.0 }
 0x1d4   :  { %220 = vmax.xlane.f32.xlu0 %v219_v38 }
 0x261   :  { %v221_v41 = vpop.xlane.xlu0 %220 }
 0x262   :  { %v222_v42 = vsub.f32 %v219_v38, %v221_v41 }
 0x264   :  { %v223_v43 = vmul.f32 1.442695, %v222_v42 }
 0x266   :  { %354 = vpow2.f32 %v223_v43 }
 0x270   :  { %v355_v44 = vpop.eup %354 }
 0x271   :  { %225 = vadd.xlane.f32.xlu0 %v355_v44 }
 0x275   :  { %247 = vadd.xlane.f32.xlu0 %v246_v45 }
 0x2fe   :  { %v226_v46 = vpop.xlane.xlu0 %225 }
 0x2ff   :  { %356 = vlog2.f32 %v226_v46 }
 0x300   :  { %358 = vrcp.f32 %v226_v46 }
 0x302   :  { %v248_v56 = vpop.xlane.xlu0 %247 }
 0x303   :  { %v251_v59 = vsel %vm250_vm5, %v248_v56, 0.0 }
 0x309   :  { %v357_v48 = vpop.eup %356 }
 0x30a   :  { %v359_v49 = vpop.eup %358  ;;  %v228_v50 = vmul.f32 0.6931472, %v357_v48 }
 0x30b   :  { %v231_v52 = vmul.f32 %v359_v49, %v355_v44 }
 0x30c   :  { %v229_v51 = vsub.f32 %v222_v42, %v228_v50 }
 0x30e   :  { %v242_v53 = vsel %vm241_vm4, %v229_v51, 0.0  ;;  %v232_v54 = vmul.f32 %v231_v52, %v229_v51 }
 0x30f   :  { %243 = vadd.xlane.f32.xlu0 %v242_v53 }
 0x310   :  { %v233_v55 = vsel %vm218_vm2, %v232_v54, 0.0 }
 0x311   :  { %234 = vadd.xlane.f32.xlu1 %v233_v55 }
 0x39c   :  { %v244_v60 = vpop.xlane.xlu0 %243 }
 0x39e   :  { %v235_v57 = vpop.xlane.xlu1 %234 }
 0x39f   :  { %v236_v58 = vsub.f32 0.0, %v235_v57 }
 0x3a1   :  { %v252_v61 = vsel %vm249_vm6, %v236_v58, %v251_v59 }
 0x3a2   :  { %v253_v62 = vsel %vm245_vm3, %v244_v60, %v252_v61 }
 0x3a3   :  { %v254_v63 = vsel %vm218_vm2, %v231_v52, %v253_v62 }
 0x3a4   :  { %255 = vst [vmem:[%s488_s6] sm:$0xff] %v254_v63 }
 0x3a5   :  { %260 = vsyncpa [#allocation3], 1 }

</bundles_post_ra>
